<compile_context>
chip_gen: v7x
topology: tpu7x:2x2x1
jax: 0.10.0
libtpu: 0.0.40
codegen_flags: <defaults>
</compile_context>

<pallas_src>
import jax
import jax.numpy as jnp
from jax.experimental import pallas as pl
from jax.experimental.pallas import tpu as pltpu

# ---------------------------------------------------------------------------
# Config (matches a small BackboneNet config)
# ---------------------------------------------------------------------------
INPUT_DIM = 4
HIDDEN_DIM = 32
OUTPUT_DIM = 2
LAYERS_NUM = 3          # number of hidden MLPBlocks
NEG_SLOPE = 0.01        # nn.LeakyReLU() default negative_slope
BATCH = 2048            # total rows processed per call
BATCH_TILE = 512        # batch tile (lane dim) per grid step, multiple of 128


def _leaky_relu(x):
    return jnp.where(x > 0, x, NEG_SLOPE * x)


# ---------------------------------------------------------------------------
# Kernel: full MLP forward for one batch tile, transposed (feature, batch)
# ---------------------------------------------------------------------------
def backbone_kernel(xT_ref, w_in_t_ref, b_in_ref, w_h_t_ref, b_h_ref,
                    w_out_t_ref, oT_ref):
    # xT_ref:     (INPUT_DIM, BATCH_TILE)
    # w_in_t_ref: (HIDDEN_DIM, INPUT_DIM)        = W_in^T
    # b_in_ref:   (HIDDEN_DIM, 1)
    # w_h_t_ref:  (LAYERS_NUM, HIDDEN_DIM, HIDDEN_DIM) = per-layer W^T
    # b_h_ref:    (LAYERS_NUM, HIDDEN_DIM, 1)
    # w_out_t_ref:(OUTPUT_DIM, HIDDEN_DIM)       = W_out^T
    # oT_ref:     (OUTPUT_DIM, BATCH_TILE)

    # Input MLPBlock: Linear + LeakyReLU   (h^T = W^T @ x^T + b)
    h = jnp.dot(w_in_t_ref[...], xT_ref[...],
                preferred_element_type=jnp.float32) + b_in_ref[...]
    h = _leaky_relu(h)

    # Hidden MLPBlocks (static unrolled loop — LAYERS_NUM is compile-time const)
    for l in range(LAYERS_NUM):
        h = jnp.dot(w_h_t_ref[l], h,
                    preferred_element_type=jnp.float32) + b_h_ref[l]
        h = _leaky_relu(h)

    # Output Linear (no bias): (OUTPUT_DIM, HIDDEN) @ (HIDDEN, BATCH_TILE)
    oT_ref[...] = jnp.dot(w_out_t_ref[...], h,
                          preferred_element_type=jnp.float32).astype(oT_ref.dtype)


# ---------------------------------------------------------------------------
# Wrapper
# ---------------------------------------------------------------------------
def backbone_net(x, params):
    """x: (B, INPUT_DIM) -> (B, OUTPUT_DIM). Params stored math-style (in, out)."""
    w_in, b_in, w_h, b_h, w_out = params
    B = x.shape[0]
    assert B % BATCH_TILE == 0
    grid = (B // BATCH_TILE,)

    # One-time, tiny transposes in the wrapper so the kernel is lane-dense
    # (batch on lanes) and never transposes anything itself.
    xT = x.T                                        # (INPUT_DIM, B)
    w_in_t = w_in.T                                 # (HIDDEN_DIM, INPUT_DIM)
    b_in_t = b_in.reshape(HIDDEN_DIM, 1)            # (HIDDEN_DIM, 1)
    w_h_t = jnp.transpose(w_h, (0, 2, 1))           # (L, HIDDEN_DIM, HIDDEN_DIM)
    b_h_t = b_h.reshape(LAYERS_NUM, HIDDEN_DIM, 1)  # (L, HIDDEN_DIM, 1)
    w_out_t = w_out.T                               # (OUTPUT_DIM, HIDDEN_DIM)

    # Weights/biases: full-array blocks, same block for every grid step.
    def full(shape):
        return pl.BlockSpec(shape, lambda i, _n=len(shape): (0,) * _n)

    # Advisory cost estimate for XLA scheduling.
    flops = 2 * B * (INPUT_DIM * HIDDEN_DIM
                     + LAYERS_NUM * HIDDEN_DIM * HIDDEN_DIM
                     + HIDDEN_DIM * OUTPUT_DIM)
    weight_bytes = 4 * (INPUT_DIM * HIDDEN_DIM + HIDDEN_DIM
                        + LAYERS_NUM * (HIDDEN_DIM * HIDDEN_DIM + HIDDEN_DIM)
                        + HIDDEN_DIM * OUTPUT_DIM)
    bytes_accessed = 4 * B * (INPUT_DIM + OUTPUT_DIM) + weight_bytes

    oT = pl.pallas_call(
        backbone_kernel,
        out_shape=jax.ShapeDtypeStruct((OUTPUT_DIM, B), x.dtype),
        grid_spec=pltpu.PrefetchScalarGridSpec(
            num_scalar_prefetch=0,
            grid=grid,
            in_specs=[
                pl.BlockSpec((INPUT_DIM, BATCH_TILE), lambda i: (0, i)),  # x^T
                full(w_in_t.shape),     # (HIDDEN_DIM, INPUT_DIM)
                full(b_in_t.shape),     # (HIDDEN_DIM, 1)
                full(w_h_t.shape),      # (L, HIDDEN_DIM, HIDDEN_DIM)
                full(b_h_t.shape),      # (L, HIDDEN_DIM, 1)
                full(w_out_t.shape),    # (OUTPUT_DIM, HIDDEN_DIM)
            ],
            out_specs=pl.BlockSpec((OUTPUT_DIM, BATCH_TILE), lambda i: (0, i)),
        ),
        compiler_params=pltpu.CompilerParams(
            dimension_semantics=("parallel",)),
        cost_estimate=pl.CostEstimate(
            flops=flops, transcendentals=0, bytes_accessed=bytes_accessed),
    )(xT, w_in_t, b_in_t, w_h_t, b_h_t, w_out_t)

    return oT.T                                     # (B, OUTPUT_DIM)


def init_params(key):
    """Deterministic synthetic parameters (PyTorch-style uniform init bounds)."""
    ks = jax.random.split(key, 2 * LAYERS_NUM + 3)

    def lin(kw, kb, fan_in, fan_out, bias=True):
        bound = 1.0 / jnp.sqrt(fan_in)
        w = jax.random.uniform(kw, (fan_in, fan_out), jnp.float32, -bound, bound)
        b = (jax.random.uniform(kb, (1, fan_out), jnp.float32, -bound, bound)
             if bias else None)
        return w, b

    w_in, b_in = lin(ks[0], ks[1], INPUT_DIM, HIDDEN_DIM)

    w_hs, b_hs = [], []
    for l in range(LAYERS_NUM):
        w, b = lin(ks[2 + 2 * l], ks[3 + 2 * l], HIDDEN_DIM, HIDDEN_DIM)
        w_hs.append(w)
        b_hs.append(b)
    w_h = jnp.stack(w_hs, axis=0)                    # (L, H, H)
    b_h = jnp.stack(b_hs, axis=0)                    # (L, 1, H)

    w_out, _ = lin(ks[-1], None, HIDDEN_DIM, OUTPUT_DIM, bias=False)
    return w_in, b_in, w_h, b_h, w_out


def reference_forward(x, params):
    """Pure-JAX reference of the PyTorch forward pass."""
    w_in, b_in, w_h, b_h, w_out = params
    h = _leaky_relu(x @ w_in + b_in)
    for l in range(LAYERS_NUM):
        h = _leaky_relu(h @ w_h[l] + b_h[l])
    return h @ w_out


if __name__ == "__main__":
    key = jax.random.PRNGKey(0)
    k_x, k_p = jax.random.split(key)

    x = jax.random.normal(k_x, (BATCH, INPUT_DIM), dtype=jnp.float32)
    params = init_params(k_p)

    out = backbone_net(x, params)
    out = jax.block_until_ready(out)

    ref = reference_forward(x, params)
    assert out.shape == (BATCH, OUTPUT_DIM)
    assert jnp.allclose(out, ref, atol=1e-5, rtol=1e-5)

    print("KERNEL_OK")
</pallas_src>

<mosaic_0001>
module attributes {stable_mosaic.version = 11 : i64} {
  func.func @backbone_kernel(%arg0: i32, %arg1: memref<4x512xf32, #tpu.memory_space<vmem>>, %arg2: memref<32x4xf32, #tpu.memory_space<vmem>>, %arg3: memref<32x1xf32, #tpu.memory_space<vmem>>, %arg4: memref<3x32x32xf32, #tpu.memory_space<vmem>>, %arg5: memref<3x32x1xf32, #tpu.memory_space<vmem>>, %arg6: memref<2x32xf32, #tpu.memory_space<vmem>>, %arg7: memref<2x512xf32, #tpu.memory_space<vmem>>) attributes {dimension_semantics = [#tpu.dimension_semantics<parallel>], iteration_bounds = array<i64: 4>, scalar_prefetch = 0 : i64, scratch_operands = 0 : i64, tpu.core_type = #tpu.core_type<tc>, window_params = [{transform_indices = @transform_0, window_bounds = array<i64: 4, 512>}, {pipeline_mode = #tpu.pipeline_mode<synchronous>, transform_indices = @transform_1, window_bounds = array<i64: 32, 4>}, {pipeline_mode = #tpu.pipeline_mode<synchronous>, transform_indices = @transform_2, window_bounds = array<i64: 32, 1>}, {pipeline_mode = #tpu.pipeline_mode<synchronous>, transform_indices = @transform_3, window_bounds = array<i64: 3, 32, 32>}, {pipeline_mode = #tpu.pipeline_mode<synchronous>, transform_indices = @transform_4, window_bounds = array<i64: 3, 32, 1>}, {pipeline_mode = #tpu.pipeline_mode<synchronous>, transform_indices = @transform_5, window_bounds = array<i64: 2, 32>}, {transform_indices = @transform_6, window_bounds = array<i64: 2, 512>}]} {
    %c0 = arith.constant 0 : index
    %c0_0 = arith.constant 0 : index
    %0 = vector.load %arg2[%c0, %c0_0] : memref<32x4xf32, #tpu.memory_space<vmem>>, vector<32x4xf32>
    %c0_1 = arith.constant 0 : index
    %c0_2 = arith.constant 0 : index
    %1 = vector.load %arg1[%c0_1, %c0_2] : memref<4x512xf32, #tpu.memory_space<vmem>>, vector<4x512xf32>
    %cst = arith.constant dense<0.000000e+00> : vector<32x512xf32>
    %2 = tpu.matmul %0, %1, %cst {dimension_numbers = #tpu.dot_dimension_numbers<[1], [0], [0], [1], [0, 0, 1, 1], [], []>} : vector<32x4xf32>, vector<4x512xf32>, vector<32x512xf32> -> vector<32x512xf32>
    %c0_3 = arith.constant 0 : index
    %c0_4 = arith.constant 0 : index
    %3 = vector.load %arg3[%c0_3, %c0_4] : memref<32x1xf32, #tpu.memory_space<vmem>>, vector<32x1xf32>
    %4 = vector.broadcast %3 : vector<32x1xf32> to vector<32x512xf32>
    %5 = arith.addf %2, %4 : vector<32x512xf32>
    %cst_5 = arith.constant 0.000000e+00 : f32
    %6 = vector.broadcast %cst_5 : f32 to vector<32x512xf32>
    %7 = arith.cmpf ogt, %5, %6 : vector<32x512xf32>
    %cst_6 = arith.constant 0.00999999977 : f32
    %8 = vector.broadcast %cst_6 : f32 to vector<32x512xf32>
    %9 = arith.mulf %8, %5 : vector<32x512xf32>
    %10 = arith.select %7, %5, %9 : vector<32x512xi1>, vector<32x512xf32>
    %c0_7 = arith.constant 0 : index
    %c0_8 = arith.constant 0 : index
    %c0_9 = arith.constant 0 : index
    %11 = vector.load %arg4[%c0_7, %c0_8, %c0_9] : memref<3x32x32xf32, #tpu.memory_space<vmem>>, vector<1x32x32xf32>
    %12 = vector.shape_cast %11 : vector<1x32x32xf32> to vector<32x32xf32>
    %cst_10 = arith.constant dense<0.000000e+00> : vector<32x512xf32>
    %13 = tpu.matmul %12, %10, %cst_10 {dimension_numbers = #tpu.dot_dimension_numbers<[1], [0], [0], [1], [0, 0, 1, 1], [], []>} : vector<32x32xf32>, vector<32x512xf32>, vector<32x512xf32> -> vector<32x512xf32>
    %c0_11 = arith.constant 0 : index
    %c0_12 = arith.constant 0 : index
    %c0_13 = arith.constant 0 : index
    %14 = vector.load %arg5[%c0_11, %c0_12, %c0_13] : memref<3x32x1xf32, #tpu.memory_space<vmem>>, vector<1x32x1xf32>
    %15 = vector.shape_cast %14 : vector<1x32x1xf32> to vector<32x1xf32>
    %16 = vector.broadcast %15 : vector<32x1xf32> to vector<32x512xf32>
    %17 = arith.addf %13, %16 : vector<32x512xf32>
    %cst_14 = arith.constant 0.000000e+00 : f32
    %18 = vector.broadcast %cst_14 : f32 to vector<32x512xf32>
    %19 = arith.cmpf ogt, %17, %18 : vector<32x512xf32>
    %cst_15 = arith.constant 0.00999999977 : f32
    %20 = vector.broadcast %cst_15 : f32 to vector<32x512xf32>
    %21 = arith.mulf %20, %17 : vector<32x512xf32>
    %22 = arith.select %19, %17, %21 : vector<32x512xi1>, vector<32x512xf32>
    %c1 = arith.constant 1 : index
    %c0_16 = arith.constant 0 : index
    %c0_17 = arith.constant 0 : index
    %23 = vector.load %arg4[%c1, %c0_16, %c0_17] : memref<3x32x32xf32, #tpu.memory_space<vmem>>, vector<1x32x32xf32>
    %24 = vector.shape_cast %23 : vector<1x32x32xf32> to vector<32x32xf32>
    %cst_18 = arith.constant dense<0.000000e+00> : vector<32x512xf32>
    %25 = tpu.matmul %24, %22, %cst_18 {dimension_numbers = #tpu.dot_dimension_numbers<[1], [0], [0], [1], [0, 0, 1, 1], [], []>} : vector<32x32xf32>, vector<32x512xf32>, vector<32x512xf32> -> vector<32x512xf32>
    %c1_19 = arith.constant 1 : index
    %c0_20 = arith.constant 0 : index
    %c0_21 = arith.constant 0 : index
    %26 = vector.load %arg5[%c1_19, %c0_20, %c0_21] : memref<3x32x1xf32, #tpu.memory_space<vmem>>, vector<1x32x1xf32>
    %27 = vector.shape_cast %26 : vector<1x32x1xf32> to vector<32x1xf32>
    %28 = vector.broadcast %27 : vector<32x1xf32> to vector<32x512xf32>
    %29 = arith.addf %25, %28 : vector<32x512xf32>
    %cst_22 = arith.constant 0.000000e+00 : f32
    %30 = vector.broadcast %cst_22 : f32 to vector<32x512xf32>
    %31 = arith.cmpf ogt, %29, %30 : vector<32x512xf32>
    %cst_23 = arith.constant 0.00999999977 : f32
    %32 = vector.broadcast %cst_23 : f32 to vector<32x512xf32>
    %33 = arith.mulf %32, %29 : vector<32x512xf32>
    %34 = arith.select %31, %29, %33 : vector<32x512xi1>, vector<32x512xf32>
    %c2 = arith.constant 2 : index
    %c0_24 = arith.constant 0 : index
    %c0_25 = arith.constant 0 : index
    %35 = vector.load %arg4[%c2, %c0_24, %c0_25] : memref<3x32x32xf32, #tpu.memory_space<vmem>>, vector<1x32x32xf32>
    %36 = vector.shape_cast %35 : vector<1x32x32xf32> to vector<32x32xf32>
    %cst_26 = arith.constant dense<0.000000e+00> : vector<32x512xf32>
    %37 = tpu.matmul %36, %34, %cst_26 {dimension_numbers = #tpu.dot_dimension_numbers<[1], [0], [0], [1], [0, 0, 1, 1], [], []>} : vector<32x32xf32>, vector<32x512xf32>, vector<32x512xf32> -> vector<32x512xf32>
    %c2_27 = arith.constant 2 : index
    %c0_28 = arith.constant 0 : index
    %c0_29 = arith.constant 0 : index
    %38 = vector.load %arg5[%c2_27, %c0_28, %c0_29] : memref<3x32x1xf32, #tpu.memory_space<vmem>>, vector<1x32x1xf32>
    %39 = vector.shape_cast %38 : vector<1x32x1xf32> to vector<32x1xf32>
    %40 = vector.broadcast %39 : vector<32x1xf32> to vector<32x512xf32>
    %41 = arith.addf %37, %40 : vector<32x512xf32>
    %cst_30 = arith.constant 0.000000e+00 : f32
    %42 = vector.broadcast %cst_30 : f32 to vector<32x512xf32>
    %43 = arith.cmpf ogt, %41, %42 : vector<32x512xf32>
    %cst_31 = arith.constant 0.00999999977 : f32
    %44 = vector.broadcast %cst_31 : f32 to vector<32x512xf32>
    %45 = arith.mulf %44, %41 : vector<32x512xf32>
    %46 = arith.select %43, %41, %45 : vector<32x512xi1>, vector<32x512xf32>
    %c0_32 = arith.constant 0 : index
    %c0_33 = arith.constant 0 : index
    %47 = vector.load %arg6[%c0_32, %c0_33] : memref<2x32xf32, #tpu.memory_space<vmem>>, vector<2x32xf32>
    %cst_34 = arith.constant dense<0.000000e+00> : vector<2x512xf32>
    %48 = tpu.matmul %47, %46, %cst_34 {dimension_numbers = #tpu.dot_dimension_numbers<[1], [0], [0], [1], [0, 0, 1, 1], [], []>} : vector<2x32xf32>, vector<32x512xf32>, vector<2x512xf32> -> vector<2x512xf32>
    %c0_35 = arith.constant 0 : index
    %c0_36 = arith.constant 0 : index
    %49 = vector.load %arg7[%c0_35, %c0_36] : memref<2x512xf32, #tpu.memory_space<vmem>>, vector<2x512xf32>
    tpu.vector_store %arg7[%c0_35, %c0_36], %48 {strides = array<i32>} : memref<2x512xf32, #tpu.memory_space<vmem>>, vector<2x512xf32>,
    return
  }
  func.func @transform_0(%arg0: i32) -> (i32, i32) {
    %c0_i32 = arith.constant 0 : i32
    %c0_i32_0 = arith.constant 0 : i32
    return %c0_i32, %arg0 : i32, i32
  }
  func.func @transform_1(%arg0: i32) -> (i32, i32) {
    %c0_i32 = arith.constant 0 : i32
    %c0_i32_0 = arith.constant 0 : i32
    %c0_i32_1 = arith.constant 0 : i32
    return %c0_i32, %c0_i32_0 : i32, i32
  }
  func.func @transform_2(%arg0: i32) -> (i32, i32) {
    %c0_i32 = arith.constant 0 : i32
    %c0_i32_0 = arith.constant 0 : i32
    %c0_i32_1 = arith.constant 0 : i32
    return %c0_i32, %c0_i32_0 : i32, i32
  }
  func.func @transform_3(%arg0: i32) -> (i32, i32, i32) {
    %c0_i32 = arith.constant 0 : i32
    %c0_i32_0 = arith.constant 0 : i32
    %c0_i32_1 = arith.constant 0 : i32
    %c0_i32_2 = arith.constant 0 : i32
    return %c0_i32, %c0_i32_0, %c0_i32_1 : i32, i32, i32
  }
  func.func @transform_4(%arg0: i32) -> (i32, i32, i32) {
    %c0_i32 = arith.constant 0 : i32
    %c0_i32_0 = arith.constant 0 : i32
    %c0_i32_1 = arith.constant 0 : i32
    %c0_i32_2 = arith.constant 0 : i32
    return %c0_i32, %c0_i32_0, %c0_i32_1 : i32, i32, i32
  }
  func.func @transform_5(%arg0: i32) -> (i32, i32) {
    %c0_i32 = arith.constant 0 : i32
    %c0_i32_0 = arith.constant 0 : i32
    %c0_i32_1 = arith.constant 0 : i32
    return %c0_i32, %c0_i32_0 : i32, i32
  }
  func.func @transform_6(%arg0: i32) -> (i32, i32) {
    %c0_i32 = arith.constant 0 : i32
    %c0_i32_0 = arith.constant 0 : i32
    return %c0_i32, %arg0 : i32, i32
  }
}

</mosaic_0001>

<bundles_post_ra>
// kernel: tpu_custom_call.1
= control target key start
LH: loop header
LB: loop body
LE: loop exit
PB: predicated region body
PF: predicated region fallthrough
CT: control target
= control target key end

     0   :  { %11 = vsyncpa [#allocation3], 0  ;;  %s2162_s0 = inlined_call_operand.vmem [shape: f32[4,2048], index: 0, kind: input, shape index: {}]   ;;  %s2163_s1 = inlined_call_operand.vmem [shape: f32[32,4], index: 1, kind: input, shape index: {}]   ;;  %s2164_s2 = inlined_call_operand.vmem [shape: f32[32,1], index: 2, kind: input, shape index: {}]   ;;  %s2165_s3 = inlined_call_operand.vmem [shape: f32[3,32,32], index: 3, kind: input, shape index: {}]   ;;  %s2166_s4 = inlined_call_operand.vmem [shape: f32[3,32,1], index: 4, kind: input, shape index: {}]   ;;  %s2167_s5 = inlined_call_operand.vmem [shape: f32[2,32], index: 5, kind: input, shape index: {}]   ;;  %s2168_s6 = inlined_call_operand.hbm [shape: f32[2,2048], index: 6, kind: output, shape index: {}]  }
   0x1   :  { %13 = vsyncpa [#allocation3 + $0x1], 0  ;;  %s1861_s21 = smov 0   ;;  %s1863_s22 = smov 0  }
   0x2   :  { %s1865_s23 = smov 0   ;;  %s1867_s24 = smov 0  }
   0x3 LB: > { %s1882_s25 = sadd.s32 4294967295, %s1820_s24   ;;  %s1581_s26 = sadd.s32 4294967294, %s1820_s24   ;;  %s1820_s24 = sphi %s1867_s24, %s2174_s24   ;;  %s1816_s23 = sphi %s1865_s23, %s2173_s23   ;;  %s1812_s22 = sphi %s1863_s22, %s2172_s22   ;;  %s1808_s21 = sphi %s1861_s21, %s2171_s21  }
   0x4   : > { %s1886_s27 = sadd.s32 1, %s1820_s24   ;;  %s157_s28 = sadd.s32 1, %s1816_s23 }
   0x5   : > { %s154_s29 = ssub.s32 %s1820_s24, %s1886_s27  ;;  %p167_p0 = scmp.ne.s32.totalorder %s1816_s23, %s1812_s22 }
   0x6   : > { %p155_p1 = scmp.eq.s32.totalorder %s154_s29, 0  ;;  %p168_p2 = scmp.eq.s32.totalorder %s1882_s25, 3 }
   0x7   : > { %p173_p3 = scmp.ne.s32.totalorder %s1812_s22, %s1808_s21  ;;  %p174_p4 = scmp.eq.s32.totalorder %s1581_s26, 3 }
   0x8   : > { %s1897_s30 = scalar_select %p155_p1, %s1816_s23, %s157_s28  }
   0x9   : > { %p1899_p5 = por %p168_p2, %p167_p0  ;;  %p1903_p6 = por %p174_p4, %p173_p3 }
   0xa   : > { %p1584_p7 = scmp.ge.s32.totalorder %s1820_s24, 1  ;;  %p216_p8 = scmp.lt.s32.totalorder %s1820_s24, 5 }
   0xc   : > { %p217_p9 = pnand %p1584_p7, %p216_p8 }
   0xd   : > { %s1586_s9 = sshll.u32 (!%p217_p9), %s1882_s25, 2  ;;  %v1822_v0 = vmov (!%p217_p9), 0.0   ;;  %v259_v1 = vld [vmem:[%s2164_s2] sm:$0xff] (!%p217_p9)  ;;  %v1823_v2 = vmov (!%p217_p9), 0   ;;  %v261_v3 = vld [vmem:[%s2164_s2 + $0x10] sm:$0xff] (!%p217_p9)  ;;  %v260_v4 = vld [vmem:[%s2164_s2 + $0x8] sm:$0xff] (!%p217_p9) }
   0xe   : > { %220 = sbr.rel (%p217_p9) target bundleno = 1210 (0x4ba), region = 44  ;;  %p247_p10 = scmp.lt.s32.totalorder (!%p217_p9), %s1586_s9, 15  ;;  %373 = vmatprep.mubr.f32.mxu0 (!%p217_p9), %v1822_v0  ;;  %462 = vmatprep.mubr.f32.mxu1 (!%p217_p9), %v1822_v0  ;;  %v262_v5 = vld [vmem:[%s2164_s2 + $0x18] sm:$0xff] (!%p217_p9)  ;;  %vm300_vm0 = vcmask (!%p217_p9), 1043456   ;;  %v253_v10 = vld [vmem:[%s2163_s1] sm:$0xff] (!%p217_p9)  ;;  %vm287_vm1 = vcmask (!%p217_p9), 31744  }
   0xf   : > { %1754 = vset.pattern.permute.xlu0 (!%p217_p9), %v1823_v2  ;;  %1755 = vset.pattern.permute.xlu1 (!%p217_p9), %v1823_v2  ;;  %v539_v11 = vld [vmem:[%s2166_s4] sm:$0xff] (!%p217_p9)  ;;  %v540_v12 = vld [vmem:[%s2166_s4 + $0x8] sm:$0xff] (!%p217_p9)  ;;  %v541_v14 = vld [vmem:[%s2166_s4 + $0x10] sm:$0xff] (!%p217_p9)  ;;  %s243_s20 = sand.u32 (!%p217_p9), 1, %s1812_s22   ;;  %s1647_s28 = sshll.u32 (!%p217_p9), %s1882_s25, 7 }
  0x10   : > { %265 = vperm.xlu0 (!%p217_p9), %1754, %v259_v1   ;;  %275 = vperm.xlu1 (!%p217_p9), %1755, %v261_v3   ;;  %v254_v13 = vld [vmem:[%s2163_s1 + $0x8] sm:$0xff] (!%p217_p9)  ;;  %v542_v15 = vld [vmem:[%s2166_s4 + $0x18] sm:$0xff] (!%p217_p9)  ;;  %v255_v16 = vld [vmem:[%s2163_s1 + $0x10] sm:$0xff] (!%p217_p9)  ;;  %s2120_s12 = scalar_lea.hbm (!%p217_p9), %s2168_s6, %s1647_s28  ;;  %s1508_s13 = scalar_lea.sflag (!%p217_p9), [#allocation3], %s243_s20 }
  0x11   : > { %v1612_v17 = vld [vmem:[%s2166_s4 + $0x20] sm:$0xff] (!%p217_p9)  ;;  %v1613_v18 = vld [vmem:[%s2166_s4 + $0x28] sm:$0xff] (!%p217_p9)  ;;  %v256_v19 = vld [vmem:[%s2163_s1 + $0x18] sm:$0xff] (!%p217_p9)  ;;  %s1825_s25 = smov (!%p217_p9), [#allocation2]  }
  0x12   : > { %v1614_v20 = vld [vmem:[%s2166_s4 + $0x30] sm:$0xff] (!%p217_p9)  ;;  %v1615_v21 = vld [vmem:[%s2166_s4 + $0x38] sm:$0xff] (!%p217_p9)  ;;  %v1628_v22 = vld [vmem:[%s2166_s4 + $0x40] sm:$0xff] (!%p217_p9)  ;;  %s1762_s15 = sshll.u32 (!%p217_p9), %s1825_s25, 4  ;;  %s1763_s15 = int_to_ptr.vmem [resolvable:$false] %s1762_s15 }
  0x13   : > { %v1629_v23 = vld [vmem:[%s2166_s4 + $0x48] sm:$0xff] (!%p217_p9)  ;;  %v1630_v24 = vld [vmem:[%s2166_s4 + $0x50] sm:$0xff] (!%p217_p9)  ;;  %v1631_v25 = vld [vmem:[%s2166_s4 + $0x58] sm:$0xff] (!%p217_p9)  ;;  %s1764_s16 = scalar_lea.vmem (!%p217_p9), %s1763_s15, 256 }
  0x14   : > { %270 = vperm.xlu0 (!%p217_p9), %1754, %v260_v4   ;;  %280 = vperm.xlu1 (!%p217_p9), %1755, %v262_v5  }
  0x15   : > { %s2176_s9 = smov (!%p247_p10, %s1586_s9), 15 }
  0x16   : > { %s1587_s18 = sshll.u32 %s2176_s9, 2 }
  0x17   : > { %s250_s26 = scalar_lea.vmem %s2162_s0, %s1587_s18 }
  0x18   : > { %v257_v6 = vld [vmem:[%s250_s26] sm:$0xff]  ;;  %v258_v7 = vld [vmem:[%s250_s26 + $0x8] sm:$0xff]  ;;  %545 = vperm.xlu0 %1754, %v539_v11   ;;  %550 = vperm.xlu1 %1755, %v540_v12   ;;  %s1585_s26 = sshll.u32 %s243_s20, 3 }
  0x19   : > { %v285_v8 = vcombine.high %v257_v6, %v257_v6  ;;  %v286_v9 = vcombine.high %v258_v7, %v258_v7  ;;  %s245_s29 = scalar_lea.vmem [#allocation2], %s1585_s26 }
  0x1a   : > { %s1522_s9 = sshll.u32 %s245_s29, 4  ;;  %s2122_s9 = int_to_ptr.vmem [resolvable:$true] %s1522_s9 }
  0x1b   : > { %1588 = vmatprep.subr.msk.mxu0 %vm300_vm0, %v285_v8  ;;  %1594 = vmatprep.subr.msk.mxu1 %vm300_vm0, %v286_v9  ;;  %s1758_s14 = scalar_lea.vmem %s2122_s9, 128  ;;  %p1765_p0 = scmp.lt.s32.totalorder %s2122_s9, %s1763_s15 }
  0x1c   : > { %1589 = vmatpush1.msk.msra.mxu0 %vm300_vm0, %v257_v6  ;;  %1595 = vmatpush1.msk.msra.mxu1 %vm300_vm0, %v258_v7  ;;  %p1759_p11 = scmp.ne.s32.totalorder %s2122_s9, %s1758_s14  ;;  %p1766_p1 = scmp.lt.s32.totalorder %s1764_s16, %s1758_s14 }
  0x1d   : > { %1590 = vmatmul.mubr.msk.f32.vlgmr.msra.gmra.mrb[0].mxu0 %vm287_vm1, %v253_v10  ;;  %1596 = vmatmul.mubr.msk.f32.vlgmr.msra.gmra.mrb[0].mxu1 %vm287_vm1, %v253_v10 }
  0x1e   : > { %379 = vmatprep.mubr.f32.mxu0 %v1822_v0  ;;  %468 = vmatprep.mubr.f32.mxu1 %v1822_v0  ;;  %p1760_p12 = pnand %p1759_p11, %p1899_p5  ;;  %p1767_p2 = por %p1766_p1, %p1765_p0 }
  0x1f   : > { %555 = vperm.xlu0 %1754, %v541_v14   ;;  %560 = vperm.xlu1 %1755, %v542_v15  }
  0x20   : > { %p1761_p13 = pneg %p1760_p12 }
  0x21   : > { %1591 = vmatmul.mubr.msk.f32.gmra.mrb[2].mxu0 %vm287_vm1, %v254_v13  ;;  %1597 = vmatmul.mubr.msk.f32.gmra.mrb[2].mxu1 %vm287_vm1, %v254_v13 }
  0x22   : > { %385 = vmatprep.mubr.f32.mxu0 %v1822_v0  ;;  %474 = vmatprep.mubr.f32.mxu1 %v1822_v0  ;;  %p1768_p3 = pnand %p1767_p2, %p1761_p13 }
  0x23   : > { %814 = vperm.xlu0 %1754, %v1612_v17   ;;  %819 = vperm.xlu1 %1755, %v1613_v18  }
  0x25   : > { %1592 = vmatmul.mubr.msk.f32.gmra.mrb[4].mxu0 %vm287_vm1, %v255_v16  ;;  %1598 = vmatmul.mubr.msk.f32.gmra.mrb[4].mxu1 %vm287_vm1, %v255_v16 }
  0x26   : > { %391 = vmatprep.mubr.f32.mxu0 %v1822_v0  ;;  %480 = vmatprep.mubr.f32.mxu1 %v1822_v0 }
  0x27   : > { %824 = vperm.xlu0 %1754, %v1614_v20   ;;  %829 = vperm.xlu1 %1755, %v1615_v21  }
  0x29   : > { %1593 = vmatmul.mubr.msk.f32.gmra.mrb[6].mxu0 %vm287_vm1, %v256_v19  ;;  %1599 = vmatmul.mubr.msk.f32.gmra.mrb[6].mxu1 %vm287_vm1, %v256_v19 }
  0x2a   : > { %640 = vmatprep.mubr.f32.mxu0 %v1822_v0  ;;  %729 = vmatprep.mubr.f32.mxu1 %v1822_v0 }
  0x2b   : > { %1082 = vperm.xlu0 %1754, %v1628_v22   ;;  %1087 = vperm.xlu1 %1755, %v1629_v23  }
  0x2f   : > { %1092 = vperm.xlu0 %1754, %v1630_v24   ;;  %1097 = vperm.xlu1 %1755, %v1631_v25  }
  0x8f   : > { %v266_v26 = vpop.permute.xlu0 %265  ;;  %v276_v49 = vpop.permute.xlu1 %275 }
  0x93   : > { %v271_v36 = vpop.permute.xlu0 %270  ;;  %v281_v11 = vpop.permute.xlu1 %280 }
  0xf0   : > { %v375_v27 = vpop.f32.mrb[0].mxu0  ;;  %v464_v28 = vpop.f32.mrb[0].mxu1 }
  0xf1   : > { %v376_v29 = vadd.f32 %v375_v27, %v266_v26  ;;  %v465_v30 = vadd.f32 %v464_v28, %v266_v26  ;;  %v377_v31 = vpop.f32.mrb[1].mxu0  ;;  %v466_v32 = vpop.f32.mrb[1].mxu1 }
  0xf2   : > { %v378_v33 = vadd.f32 %v377_v31, %v266_v26  ;;  %v467_v34 = vadd.f32 %v466_v32, %v266_v26 }
  0xf3   : > { %v503_v35 = vmul.f32 0.01, %v376_v29  ;;  %vm487_vm2 = vcmp.gt.f32.partialorder %v376_v29, 0.0  ;;  %vm489_vm3 = vcmp.gt.f32.partialorder %v465_v30, 0.0  ;;  %v505_v37 = vmul.f32 0.01, %v465_v30 }
  0xf4   : > { %vm488_vm4 = vcmp.gt.f32.partialorder %v378_v33, 0.0  ;;  %v381_v38 = vpop.f32.mrb[2].mxu0  ;;  %v470_v39 = vpop.f32.mrb[2].mxu1  ;;  %v504_v40 = vmul.f32 0.01, %v378_v33  ;;  %vm490_vm5 = vcmp.gt.f32.partialorder %v467_v34, 0.0 }
  0xf5   : > { %v382_v41 = vadd.f32 %v381_v38, %v271_v36  ;;  %v471_v42 = vadd.f32 %v470_v39, %v271_v36  ;;  %v383_v43 = vpop.f32.mrb[3].mxu0  ;;  %v472_v44 = vpop.f32.mrb[3].mxu1  ;;  %v1991_v45 = vsel %vm487_vm2, %v376_v29, %v503_v35  ;;  %v506_v46 = vmul.f32 0.01, %v467_v34  ;;  %v535_v39 = vld [vmem:[%s2165_s3] sm:$0xff] }
  0xf6   : > { %v384_v47 = vadd.f32 %v383_v43, %v271_v36  ;;  %v473_v48 = vadd.f32 %v472_v44, %v271_v36  ;;  %v521_v52 = vsel %vm489_vm3, %v465_v30, %v505_v37  ;;  %v520_v59 = vsel %vm488_vm4, %v378_v33, %v504_v40  ;;  %v536_v40 = vld [vmem:[%s2165_s3 + $0x8] sm:$0xff]  ;;  %v546_v43 = vpop.permute.xlu0 %545 }
  0xf7   : > { %vm491_vm6 = vcmp.gt.f32.partialorder %v382_v41, 0.0  ;;  %v507_v50 = vmul.f32 0.01, %v382_v41  ;;  %vm493_vm7 = vcmp.gt.f32.partialorder %v471_v42, 0.0  ;;  %v509_v51 = vmul.f32 0.01, %v471_v42 }
  0xf8   : > { %vm492_vm8 = vcmp.gt.f32.partialorder %v384_v47, 0.0  ;;  %v508_v53 = vmul.f32 0.01, %v384_v47  ;;  %v510_v54 = vmul.f32 0.01, %v473_v48  ;;  %vm494_vm9 = vcmp.gt.f32.partialorder %v473_v48, 0.0 }
  0xf9   : > { %v523_v55 = vsel %vm491_vm6, %v382_v41, %v507_v50  ;;  %v525_v56 = vsel %vm493_vm7, %v471_v42, %v509_v51  ;;  %v387_v57 = vpop.f32.mrb[4].mxu0  ;;  %v476_v58 = vpop.f32.mrb[4].mxu1  ;;  %v522_v8 = vsel %vm490_vm5, %v467_v34, %v506_v46  ;;  %vm563_vm2 = vcmask 261120   ;;  %v537_v41 = vld [vmem:[%s2165_s3 + $0x10] sm:$0xff]  ;;  %v538_v42 = vld [vmem:[%s2165_s3 + $0x18] sm:$0xff] }
  0xfa   : > { %v1650_v60 = vpack.c.bf16 %v523_v55, %v1991_v45  ;;  %v1658_v61 = vpack.c.bf16 %v525_v56, %v521_v52  ;;  %v388_v62 = vadd.f32 %v387_v57, %v276_v49  ;;  %v477_v63 = vadd.f32 %v476_v58, %v276_v49  ;;  %v389_v1 = vpop.f32.mrb[5].mxu0  ;;  %v478_v2 = vpop.f32.mrb[5].mxu1 }
  0xfb   : > { %v390_v3 = vadd.f32 %v389_v1, %v276_v49  ;;  %v479_v4 = vadd.f32 %v478_v2, %v276_v49  ;;  %v524_v7 = vsel %vm492_vm8, %v384_v47, %v508_v53  ;;  %v526_v10 = vsel %vm494_vm9, %v473_v48, %v510_v54  ;;  %v551_v53 = vpop.permute.xlu1 %550 }
  0xfc   : > { %v393_v5 = vpop.f32.mrb[6].mxu0  ;;  %v482_v6 = vpop.f32.mrb[6].mxu1  ;;  %vm495_vm10 = vcmp.gt.f32.partialorder %v388_v62, 0.0  ;;  %v511_v9 = vmul.f32 0.01, %v388_v62  ;;  %vm497_vm11 = vcmp.gt.f32.partialorder %v477_v63, 0.0  ;;  %v1648_v22 = vpack.c.bf16 %v524_v7, %v520_v59 }
  0xfd   : > { %v513_v12 = vmul.f32 0.01, %v477_v63  ;;  %vm496_vm12 = vcmp.gt.f32.partialorder %v390_v3, 0.0  ;;  %v512_v13 = vmul.f32 0.01, %v390_v3  ;;  %vm498_vm13 = vcmp.gt.f32.partialorder %v479_v4, 0.0 }
  0xfe   : > { %v527_v14 = vsel %vm495_vm10, %v388_v62, %v511_v9  ;;  %v514_v15 = vmul.f32 0.01, %v479_v4  ;;  %v394_v16 = vadd.f32 %v393_v5, %v281_v11  ;;  %v483_v17 = vadd.f32 %v482_v6, %v281_v11  ;;  %v395_v18 = vpop.f32.mrb[7].mxu0  ;;  %v484_v19 = vpop.f32.mrb[7].mxu1  ;;  %1649 = vmatprep.subr.bf16.mxu0 %v1648_v22 }
  0xff   : > { %v396_v20 = vadd.f32 %v395_v18, %v281_v11  ;;  %v485_v21 = vadd.f32 %v484_v19, %v281_v11  ;;  %v1656_v23 = vpack.c.bf16 %v526_v10, %v522_v8  ;;  %v529_v28 = vsel %vm497_vm11, %v477_v63, %v513_v12  ;;  %1651 = vmatpush1.bf16.msra.mxu0 %v1650_v60  ;;  %v556_v5 = vpop.permute.xlu0 %555 }
 0x100   : > { %vm499_vm14 = vcmp.gt.f32.partialorder %v394_v16, 0.0  ;;  %v515_v24 = vmul.f32 0.01, %v394_v16  ;;  %vm501_vm15 = vcmp.gt.f32.partialorder %v483_v17, 0.0  ;;  %v517_v25 = vmul.f32 0.01, %v483_v17 }
 0x101   : > { %vm500_vm0 = vcmp.gt.f32.partialorder %v396_v20, 0.0  ;;  %v516_v26 = vmul.f32 0.01, %v396_v20  ;;  %vm502_vm1 = vcmp.gt.f32.partialorder %v485_v21, 0.0  ;;  %v518_v27 = vmul.f32 0.01, %v485_v21  ;;  %1657 = vmatprep.subr.bf16.mxu1 %v1656_v23 }
 0x102   : > { %v531_v29 = vsel %vm499_vm14, %v394_v16, %v515_v24  ;;  %v533_v30 = vsel %vm501_vm15, %v483_v17, %v517_v25  ;;  %1659 = vmatpush1.bf16.msra.mxu1 %v1658_v61  ;;  %v528_v33 = vsel %vm496_vm12, %v390_v3, %v512_v13  ;;  %v530_v36 = vsel %vm498_vm13, %v479_v4, %v514_v15 }
 0x103   : > { %v1654_v31 = vpack.c.bf16 %v531_v29, %v527_v14  ;;  %v1662_v32 = vpack.c.bf16 %v533_v30, %v529_v28  ;;  %v532_v34 = vsel %vm500_vm0, %v396_v20, %v516_v26  ;;  %v534_v37 = vsel %vm502_vm1, %v485_v21, %v518_v27  ;;  %v561_v27 = vpop.permute.xlu1 %560 }
 0x104   : > { %v1652_v35 = vpack.c.bf16 %v532_v34, %v528_v33  ;;  %v1660_v38 = vpack.c.bf16 %v534_v37, %v530_v36 }
 0x106   : > { %1653 = vmatprep.subr.bf16.mxu0 %v1652_v35  ;;  %1661 = vmatprep.subr.bf16.mxu1 %v1660_v38 }
 0x107   : > { %1655 = vmatpush1.bf16.msra.mxu0 %v1654_v31  ;;  %1663 = vmatpush1.bf16.msra.mxu1 %v1662_v32 }
 0x10a   : > { %1600 = vmatmul.mubr.msk.f32.vlgmr.msra.gmra.mrb[8].mxu0 %vm563_vm2, %v535_v39  ;;  %1604 = vmatmul.mubr.msk.f32.vlgmr.msra.gmra.mrb[8].mxu1 %vm563_vm2, %v535_v39 }
 0x10b   : > { %646 = vmatprep.mubr.f32.mxu0 %v1822_v0  ;;  %735 = vmatprep.mubr.f32.mxu1 %v1822_v0 }
 0x10e   : > { %1601 = vmatmul.mubr.msk.f32.gmra.mrb[10].mxu0 %vm563_vm2, %v536_v40  ;;  %1605 = vmatmul.mubr.msk.f32.gmra.mrb[10].mxu1 %vm563_vm2, %v536_v40 }
 0x10f   : > { %652 = vmatprep.mubr.f32.mxu0 %v1822_v0  ;;  %741 = vmatprep.mubr.f32.mxu1 %v1822_v0 }
 0x112   : > { %1602 = vmatmul.mubr.msk.f32.gmra.mrb[12].mxu0 %vm563_vm2, %v537_v41  ;;  %1606 = vmatmul.mubr.msk.f32.gmra.mrb[12].mxu1 %vm563_vm2, %v537_v41 }
 0x113   : > { %658 = vmatprep.mubr.f32.mxu0 %v1822_v0  ;;  %747 = vmatprep.mubr.f32.mxu1 %v1822_v0 }
 0x116   : > { %1603 = vmatmul.mubr.msk.f32.gmra.mrb[14].mxu0 %vm563_vm2, %v538_v42  ;;  %1607 = vmatmul.mubr.msk.f32.gmra.mrb[14].mxu1 %vm563_vm2, %v538_v42 }
 0x117   : > { %908 = vmatprep.mubr.f32.mxu0 %v1822_v0  ;;  %997 = vmatprep.mubr.f32.mxu1 %v1822_v0 }
 0x1dd   : > { %v642_v44 = vpop.f32.mrb[8].mxu0  ;;  %v731_v46 = vpop.f32.mrb[8].mxu1 }
 0x1de   : > { %v643_v45 = vadd.f32 %v642_v44, %v546_v43  ;;  %v644_v47 = vpop.f32.mrb[9].mxu0  ;;  %v732_v48 = vadd.f32 %v731_v46, %v546_v43  ;;  %v733_v50 = vpop.f32.mrb[9].mxu1 }
 0x1df   : > { %v645_v49 = vadd.f32 %v644_v47, %v546_v43  ;;  %v734_v52 = vadd.f32 %v733_v50, %v546_v43 }
 0x1e0   : > { %v770_v51 = vmul.f32 0.01, %v643_v45  ;;  %vm754_vm3 = vcmp.gt.f32.partialorder %v643_v45, 0.0  ;;  %vm756_vm4 = vcmp.gt.f32.partialorder %v732_v48, 0.0  ;;  %v772_v54 = vmul.f32 0.01, %v732_v48 }
 0x1e1   : > { %v648_v55 = vpop.f32.mrb[10].mxu0  ;;  %v737_v56 = vpop.f32.mrb[10].mxu1  ;;  %vm755_vm5 = vcmp.gt.f32.partialorder %v645_v49, 0.0  ;;  %v771_v57 = vmul.f32 0.01, %v645_v49  ;;  %vm757_vm8 = vcmp.gt.f32.partialorder %v734_v52, 0.0 }
 0x1e2   : > { %v649_v58 = vadd.f32 %v648_v55, %v551_v53  ;;  %v738_v59 = vadd.f32 %v737_v56, %v551_v53  ;;  %v650_v60 = vpop.f32.mrb[11].mxu0  ;;  %v739_v61 = vpop.f32.mrb[11].mxu1  ;;  %v786_v62 = vsel %vm754_vm3, %v643_v45, %v770_v51  ;;  %v773_v63 = vmul.f32 0.01, %v734_v52  ;;  %v1608_v56 = vld [vmem:[%s2165_s3 + $0x20] sm:$0xff] }
 0x1e3   : > { %v651_v1 = vadd.f32 %v650_v60, %v551_v53  ;;  %v740_v2 = vadd.f32 %v739_v61, %v551_v53  ;;  %v788_v8 = vsel %vm756_vm4, %v732_v48, %v772_v54  ;;  %v787_v24 = vsel %vm755_vm5, %v645_v49, %v771_v57  ;;  %v1609_v57 = vld [vmem:[%s2165_s3 + $0x28] sm:$0xff]  ;;  %v815_v60 = vpop.permute.xlu0 %814 }
 0x1e4   : > { %vm758_vm6 = vcmp.gt.f32.partialorder %v649_v58, 0.0  ;;  %v774_v3 = vmul.f32 0.01, %v649_v58  ;;  %vm760_vm7 = vcmp.gt.f32.partialorder %v738_v59, 0.0  ;;  %v776_v4 = vmul.f32 0.01, %v738_v59 }
 0x1e5   : > { %vm759_vm9 = vcmp.gt.f32.partialorder %v651_v1, 0.0  ;;  %v775_v6 = vmul.f32 0.01, %v651_v1  ;;  %v777_v7 = vmul.f32 0.01, %v740_v2  ;;  %vm761_vm10 = vcmp.gt.f32.partialorder %v740_v2, 0.0 }
 0x1e6   : > { %v790_v9 = vsel %vm758_vm6, %v649_v58, %v774_v3  ;;  %v792_v10 = vsel %vm760_vm7, %v738_v59, %v776_v4  ;;  %v654_v11 = vpop.f32.mrb[12].mxu0  ;;  %v743_v12 = vpop.f32.mrb[12].mxu1  ;;  %v789_v25 = vsel %vm757_vm8, %v734_v52, %v773_v63  ;;  %v1610_v58 = vld [vmem:[%s2165_s3 + $0x30] sm:$0xff]  ;;  %v1611_v59 = vld [vmem:[%s2165_s3 + $0x38] sm:$0xff] }
 0x1e7   : > { %v1666_v13 = vpack.c.bf16 %v790_v9, %v786_v62  ;;  %v1674_v14 = vpack.c.bf16 %v792_v10, %v788_v8  ;;  %v655_v15 = vadd.f32 %v654_v11, %v556_v5  ;;  %v744_v16 = vadd.f32 %v743_v12, %v556_v5  ;;  %v656_v17 = vpop.f32.mrb[13].mxu0  ;;  %v745_v18 = vpop.f32.mrb[13].mxu1 }
 0x1e8   : > { %v657_v19 = vadd.f32 %v656_v17, %v556_v5  ;;  %v746_v20 = vadd.f32 %v745_v18, %v556_v5  ;;  %v791_v22 = vsel %vm759_vm9, %v651_v1, %v775_v6  ;;  %v793_v26 = vsel %vm761_vm10, %v740_v2, %v777_v7  ;;  %v820_v7 = vpop.permute.xlu1 %819 }
 0x1e9   : > { %v660_v21 = vpop.f32.mrb[14].mxu0  ;;  %v778_v23 = vmul.f32 0.01, %v655_v15  ;;  %vm762_vm11 = vcmp.gt.f32.partialorder %v655_v15, 0.0  ;;  %vm764_vm12 = vcmp.gt.f32.partialorder %v744_v16, 0.0  ;;  %v749_v31 = vpop.f32.mrb[14].mxu1  ;;  %v1664_v33 = vpack.c.bf16 %v791_v22, %v787_v24 }
 0x1ea   : > { %v780_v28 = vmul.f32 0.01, %v744_v16  ;;  %vm763_vm13 = vcmp.gt.f32.partialorder %v657_v19, 0.0  ;;  %v779_v29 = vmul.f32 0.01, %v657_v19  ;;  %vm765_vm14 = vcmp.gt.f32.partialorder %v746_v20, 0.0  ;;  %v825_v22 = vpop.permute.xlu0 %824 }
 0x1eb   : > { %v661_v30 = vadd.f32 %v660_v21, %v561_v27  ;;  %v662_v32 = vpop.f32.mrb[15].mxu0  ;;  %v781_v34 = vmul.f32 0.01, %v746_v20  ;;  %v750_v35 = vadd.f32 %v749_v31, %v561_v27  ;;  %v751_v37 = vpop.f32.mrb[15].mxu1  ;;  %v1672_v38 = vpack.c.bf16 %v793_v26, %v789_v25  ;;  %1665 = vmatprep.subr.bf16.mxu0 %v1664_v33 }
 0x1ec   : > { %v663_v36 = vadd.f32 %v662_v32, %v561_v27  ;;  %v794_v39 = vsel %vm762_vm11, %v655_v15, %v778_v23  ;;  %v752_v41 = vadd.f32 %v751_v37, %v561_v27  ;;  %1667 = vmatpush1.bf16.msra.mxu0 %v1666_v13  ;;  %v796_v44 = vsel %vm764_vm12, %v744_v16, %v780_v28 }
 0x1ed   : > { %vm766_vm15 = vcmp.gt.f32.partialorder %v661_v30, 0.0  ;;  %v782_v40 = vmul.f32 0.01, %v661_v30  ;;  %vm768_vm0 = vcmp.gt.f32.partialorder %v750_v35, 0.0  ;;  %v784_v42 = vmul.f32 0.01, %v750_v35  ;;  %1673 = vmatprep.subr.bf16.mxu1 %v1672_v38 }
 0x1ee   : > { %vm767_vm1 = vcmp.gt.f32.partialorder %v663_v36, 0.0  ;;  %v783_v43 = vmul.f32 0.01, %v663_v36  ;;  %vm769_vm3 = vcmp.gt.f32.partialorder %v752_v41, 0.0  ;;  %v785_v46 = vmul.f32 0.01, %v752_v41  ;;  %1675 = vmatpush1.bf16.msra.mxu1 %v1674_v14 }
 0x1ef   : > { %v798_v45 = vsel %vm766_vm15, %v661_v30, %v782_v40  ;;  %v800_v48 = vsel %vm768_vm0, %v750_v35, %v784_v42  ;;  %v795_v49 = vsel %vm763_vm13, %v657_v19, %v779_v29  ;;  %v797_v53 = vsel %vm765_vm14, %v746_v20, %v781_v34 }
 0x1f0   : > { %v1670_v47 = vpack.c.bf16 %v798_v45, %v794_v39  ;;  %v799_v50 = vsel %vm767_vm1, %v663_v36, %v783_v43  ;;  %v1678_v51 = vpack.c.bf16 %v800_v48, %v796_v44  ;;  %v801_v54 = vsel %vm769_vm3, %v752_v41, %v785_v46  ;;  %v830_v44 = vpop.permute.xlu1 %829 }
 0x1f1   : > { %v1668_v52 = vpack.c.bf16 %v799_v50, %v795_v49  ;;  %v1676_v55 = vpack.c.bf16 %v801_v54, %v797_v53 }
 0x1f3   : > { %1669 = vmatprep.subr.bf16.mxu0 %v1668_v52  ;;  %1677 = vmatprep.subr.bf16.mxu1 %v1676_v55 }
 0x1f4   : > { %1671 = vmatpush1.bf16.msra.mxu0 %v1670_v47  ;;  %1679 = vmatpush1.bf16.msra.mxu1 %v1678_v51 }
 0x1f7   : > { %1616 = vmatmul.mubr.msk.f32.vlgmr.msra.gmra.mrb[16].mxu0 %vm563_vm2, %v1608_v56  ;;  %1620 = vmatmul.mubr.msk.f32.vlgmr.msra.gmra.mrb[16].mxu1 %vm563_vm2, %v1608_v56 }
 0x1f8   : > { %914 = vmatprep.mubr.f32.mxu0 %v1822_v0  ;;  %1003 = vmatprep.mubr.f32.mxu1 %v1822_v0 }
 0x1fb   : > { %1617 = vmatmul.mubr.msk.f32.gmra.mrb[18].mxu0 %vm563_vm2, %v1609_v57  ;;  %1621 = vmatmul.mubr.msk.f32.gmra.mrb[18].mxu1 %vm563_vm2, %v1609_v57 }
 0x1fc   : > { %920 = vmatprep.mubr.f32.mxu0 %v1822_v0  ;;  %1009 = vmatprep.mubr.f32.mxu1 %v1822_v0 }
 0x1ff   : > { %1618 = vmatmul.mubr.msk.f32.gmra.mrb[20].mxu0 %vm563_vm2, %v1610_v58  ;;  %1622 = vmatmul.mubr.msk.f32.gmra.mrb[20].mxu1 %vm563_vm2, %v1610_v58 }
 0x200   : > { %926 = vmatprep.mubr.f32.mxu0 %v1822_v0  ;;  %1015 = vmatprep.mubr.f32.mxu1 %v1822_v0 }
 0x203   : > { %1619 = vmatmul.mubr.msk.f32.gmra.mrb[22].mxu0 %vm563_vm2, %v1611_v59  ;;  %1623 = vmatmul.mubr.msk.f32.gmra.mrb[22].mxu1 %vm563_vm2, %v1611_v59 }
 0x204   : > { %1176 = vmatprep.mubr.f32.mxu0 %v1822_v0  ;;  %1265 = vmatprep.mubr.f32.mxu1 %v1822_v0 }
 0x2ca   : > { %v910_v61 = vpop.f32.mrb[16].mxu0  ;;  %v999_v63 = vpop.f32.mrb[16].mxu1 }
 0x2cb   : > { %v911_v62 = vadd.f32 %v910_v61, %v815_v60  ;;  %v912_v1 = vpop.f32.mrb[17].mxu0  ;;  %v1000_v2 = vadd.f32 %v999_v63, %v815_v60  ;;  %v1001_v4 = vpop.f32.mrb[17].mxu1 }
 0x2cc   : > { %v913_v3 = vadd.f32 %v912_v1, %v815_v60  ;;  %v1002_v6 = vadd.f32 %v1001_v4, %v815_v60 }
 0x2cd   : > { %v1038_v5 = vmul.f32 0.01, %v911_v62  ;;  %vm1022_vm4 = vcmp.gt.f32.partialorder %v911_v62, 0.0  ;;  %vm1024_vm5 = vcmp.gt.f32.partialorder %v1000_v2, 0.0  ;;  %v1040_v8 = vmul.f32 0.01, %v1000_v2 }
 0x2ce   : > { %v916_v9 = vpop.f32.mrb[18].mxu0  ;;  %v1005_v10 = vpop.f32.mrb[18].mxu1  ;;  %vm1023_vm6 = vcmp.gt.f32.partialorder %v913_v3, 0.0  ;;  %v1039_v11 = vmul.f32 0.01, %v913_v3  ;;  %vm1025_vm9 = vcmp.gt.f32.partialorder %v1002_v6, 0.0 }
 0x2cf   : > { %v917_v12 = vadd.f32 %v916_v9, %v820_v7  ;;  %v1006_v13 = vadd.f32 %v1005_v10, %v820_v7  ;;  %v918_v14 = vpop.f32.mrb[19].mxu0  ;;  %v1007_v15 = vpop.f32.mrb[19].mxu1  ;;  %v1054_v16 = vsel %vm1022_vm4, %v911_v62, %v1038_v5  ;;  %v1041_v17 = vmul.f32 0.01, %v1002_v6  ;;  %v1624_v10 = vld [vmem:[%s2165_s3 + $0x40] sm:$0xff] }
 0x2d0   : > { %v919_v18 = vadd.f32 %v918_v14, %v820_v7  ;;  %v1008_v19 = vadd.f32 %v1007_v15, %v820_v7  ;;  %v1056_v25 = vsel %vm1024_vm5, %v1000_v2, %v1040_v8  ;;  %v1055_v41 = vsel %vm1023_vm6, %v913_v3, %v1039_v11  ;;  %v1625_v11 = vld [vmem:[%s2165_s3 + $0x48] sm:$0xff]  ;;  %v1083_v14 = vpop.permute.xlu0 %1082 }
 0x2d1   : > { %vm1026_vm7 = vcmp.gt.f32.partialorder %v917_v12, 0.0  ;;  %v1042_v20 = vmul.f32 0.01, %v917_v12  ;;  %vm1028_vm8 = vcmp.gt.f32.partialorder %v1006_v13, 0.0  ;;  %v1044_v21 = vmul.f32 0.01, %v1006_v13 }
 0x2d2   : > { %vm1027_vm10 = vcmp.gt.f32.partialorder %v919_v18, 0.0  ;;  %v1043_v23 = vmul.f32 0.01, %v919_v18  ;;  %v1045_v24 = vmul.f32 0.01, %v1008_v19  ;;  %vm1029_vm11 = vcmp.gt.f32.partialorder %v1008_v19, 0.0 }
 0x2d3   : > { %v1058_v26 = vsel %vm1026_vm7, %v917_v12, %v1042_v20  ;;  %v1060_v27 = vsel %vm1028_vm8, %v1006_v13, %v1044_v21  ;;  %v922_v28 = vpop.f32.mrb[20].mxu0  ;;  %v1011_v29 = vpop.f32.mrb[20].mxu1  ;;  %v1057_v42 = vsel %vm1025_vm9, %v1002_v6, %v1041_v17  ;;  %v1626_v12 = vld [vmem:[%s2165_s3 + $0x50] sm:$0xff]  ;;  %v1627_v13 = vld [vmem:[%s2165_s3 + $0x58] sm:$0xff] }
 0x2d4   : > { %v1682_v30 = vpack.c.bf16 %v1058_v26, %v1054_v16  ;;  %v1690_v31 = vpack.c.bf16 %v1060_v27, %v1056_v25  ;;  %v923_v32 = vadd.f32 %v922_v28, %v825_v22  ;;  %v1012_v33 = vadd.f32 %v1011_v29, %v825_v22  ;;  %v924_v34 = vpop.f32.mrb[21].mxu0  ;;  %v1013_v35 = vpop.f32.mrb[21].mxu1 }
 0x2d5   : > { %v925_v36 = vadd.f32 %v924_v34, %v825_v22  ;;  %v1014_v37 = vadd.f32 %v1013_v35, %v825_v22  ;;  %v1059_v39 = vsel %vm1027_vm10, %v919_v18, %v1043_v23  ;;  %v1061_v43 = vsel %vm1029_vm11, %v1008_v19, %v1045_v24  ;;  %v1088_v24 = vpop.permute.xlu1 %1087 }
 0x2d6   : > { %v928_v38 = vpop.f32.mrb[22].mxu0  ;;  %v1046_v40 = vmul.f32 0.01, %v923_v32  ;;  %vm1030_vm12 = vcmp.gt.f32.partialorder %v923_v32, 0.0  ;;  %vm1032_vm13 = vcmp.gt.f32.partialorder %v1012_v33, 0.0  ;;  %v1017_v48 = vpop.f32.mrb[22].mxu1  ;;  %v1680_v50 = vpack.c.bf16 %v1059_v39, %v1055_v41 }
 0x2d7   : > { %v1048_v45 = vmul.f32 0.01, %v1012_v33  ;;  %vm1031_vm14 = vcmp.gt.f32.partialorder %v925_v36, 0.0  ;;  %v1047_v46 = vmul.f32 0.01, %v925_v36  ;;  %vm1033_vm15 = vcmp.gt.f32.partialorder %v1014_v37, 0.0 }
 0x2d8   : > { %v929_v47 = vadd.f32 %v928_v38, %v830_v44  ;;  %v930_v49 = vpop.f32.mrb[23].mxu0  ;;  %v1049_v51 = vmul.f32 0.01, %v1014_v37  ;;  %v1018_v52 = vadd.f32 %v1017_v48, %v830_v44  ;;  %v1019_v54 = vpop.f32.mrb[23].mxu1  ;;  %v1688_v55 = vpack.c.bf16 %v1061_v43, %v1057_v42  ;;  %1681 = vmatprep.subr.bf16.mxu0 %v1680_v50 }
 0x2d9   : > { %v931_v53 = vadd.f32 %v930_v49, %v830_v44  ;;  %v1062_v56 = vsel %vm1030_vm12, %v923_v32, %v1046_v40  ;;  %v1020_v58 = vadd.f32 %v1019_v54, %v830_v44  ;;  %1683 = vmatpush1.bf16.msra.mxu0 %v1682_v30  ;;  %v1064_v61 = vsel %vm1032_vm13, %v1012_v33, %v1048_v45  ;;  %v1093_v38 = vpop.permute.xlu0 %1092 }
 0x2da   : > { %vm1034_vm0 = vcmp.gt.f32.partialorder %v929_v47, 0.0  ;;  %v1050_v57 = vmul.f32 0.01, %v929_v47  ;;  %vm1036_vm1 = vcmp.gt.f32.partialorder %v1018_v52, 0.0  ;;  %v1052_v59 = vmul.f32 0.01, %v1018_v52  ;;  %1689 = vmatprep.subr.bf16.mxu1 %v1688_v55 }
 0x2db   : > { %vm1035_vm3 = vcmp.gt.f32.partialorder %v931_v53, 0.0  ;;  %v1051_v60 = vmul.f32 0.01, %v931_v53  ;;  %vm1037_vm4 = vcmp.gt.f32.partialorder %v1020_v58, 0.0  ;;  %v1053_v63 = vmul.f32 0.01, %v1020_v58  ;;  %1691 = vmatpush1.bf16.msra.mxu1 %v1690_v31 }
 0x2dc   : > { %v1066_v62 = vsel %vm1034_vm0, %v929_v47, %v1050_v57  ;;  %v1068_v2 = vsel %vm1036_vm1, %v1018_v52, %v1052_v59  ;;  %v1063_v3 = vsel %vm1031_vm14, %v925_v36, %v1047_v46  ;;  %v1065_v7 = vsel %vm1033_vm15, %v1014_v37, %v1049_v51 }
 0x2dd   : > { %v1686_v1 = vpack.c.bf16 %v1066_v62, %v1062_v56  ;;  %v1067_v4 = vsel %vm1035_vm3, %v931_v53, %v1051_v60  ;;  %v1694_v5 = vpack.c.bf16 %v1068_v2, %v1064_v61  ;;  %v1069_v8 = vsel %vm1037_vm4, %v1020_v58, %v1053_v63  ;;  %v1098_v60 = vpop.permute.xlu1 %1097 }
 0x2de   : > { %v1684_v6 = vpack.c.bf16 %v1067_v4, %v1063_v3  ;;  %v1692_v9 = vpack.c.bf16 %v1069_v8, %v1065_v7 }
 0x2e0   : > { %1685 = vmatprep.subr.bf16.mxu0 %v1684_v6  ;;  %1693 = vmatprep.subr.bf16.mxu1 %v1692_v9 }
 0x2e1   : > { %1687 = vmatpush1.bf16.msra.mxu0 %v1686_v1  ;;  %1695 = vmatpush1.bf16.msra.mxu1 %v1694_v5 }
 0x2e4   : > { %1632 = vmatmul.mubr.msk.f32.vlgmr.msra.gmra.mrb[24].mxu0 %vm563_vm2, %v1624_v10  ;;  %1636 = vmatmul.mubr.msk.f32.vlgmr.msra.gmra.mrb[24].mxu1 %vm563_vm2, %v1624_v10 }
 0x2e5   : > { %1182 = vmatprep.mubr.f32.mxu0 %v1822_v0  ;;  %1271 = vmatprep.mubr.f32.mxu1 %v1822_v0 }
 0x2e8   : > { %1633 = vmatmul.mubr.msk.f32.gmra.mrb[26].mxu0 %vm563_vm2, %v1625_v11  ;;  %1637 = vmatmul.mubr.msk.f32.gmra.mrb[26].mxu1 %vm563_vm2, %v1625_v11 }
 0x2e9   : > { %1188 = vmatprep.mubr.f32.mxu0 %v1822_v0  ;;  %1277 = vmatprep.mubr.f32.mxu1 %v1822_v0 }
 0x2ec   : > { %1634 = vmatmul.mubr.msk.f32.gmra.mrb[28].mxu0 %vm563_vm2, %v1626_v12  ;;  %1638 = vmatmul.mubr.msk.f32.gmra.mrb[28].mxu1 %vm563_vm2, %v1626_v12 }
 0x2ed   : > { %1194 = vmatprep.mubr.f32.mxu0 %v1822_v0  ;;  %1283 = vmatprep.mubr.f32.mxu1 %v1822_v0 }
 0x2f0   : > { %1635 = vmatmul.mubr.msk.f32.gmra.mrb[30].mxu0 %vm563_vm2, %v1627_v13  ;;  %1639 = vmatmul.mubr.msk.f32.gmra.mrb[30].mxu1 %vm563_vm2, %v1627_v13 }
 0x2f1   : > { %1406 = vmatprep.mubr.f32.mxu0 %v1822_v0  ;;  %1477 = vmatprep.mubr.f32.mxu1 %v1822_v0 }
 0x3b7   : > { %v1178_v15 = vpop.f32.mrb[24].mxu0  ;;  %v1267_v17 = vpop.f32.mrb[24].mxu1 }
 0x3b8   : > { %v1179_v16 = vadd.f32 %v1178_v15, %v1083_v14  ;;  %v1180_v18 = vpop.f32.mrb[25].mxu0  ;;  %v1268_v19 = vadd.f32 %v1267_v17, %v1083_v14  ;;  %v1269_v21 = vpop.f32.mrb[25].mxu1 }
 0x3b9   : > { %v1181_v20 = vadd.f32 %v1180_v18, %v1083_v14  ;;  %v1270_v23 = vadd.f32 %v1269_v21, %v1083_v14 }
 0x3ba   : > { %v1306_v22 = vmul.f32 0.01, %v1179_v16  ;;  %vm1290_vm5 = vcmp.gt.f32.partialorder %v1179_v16, 0.0  ;;  %vm1292_vm6 = vcmp.gt.f32.partialorder %v1268_v19, 0.0  ;;  %v1308_v25 = vmul.f32 0.01, %v1268_v19 }
 0x3bb   : > { %v1184_v26 = vpop.f32.mrb[26].mxu0  ;;  %v1273_v27 = vpop.f32.mrb[26].mxu1  ;;  %vm1291_vm7 = vcmp.gt.f32.partialorder %v1181_v20, 0.0  ;;  %v1307_v28 = vmul.f32 0.01, %v1181_v20  ;;  %vm1293_vm10 = vcmp.gt.f32.partialorder %v1270_v23, 0.0 }
 0x3bc   : > { %v1185_v29 = vadd.f32 %v1184_v26, %v1088_v24  ;;  %v1274_v0 = vadd.f32 %v1273_v27, %v1088_v24  ;;  %v1186_v30 = vpop.f32.mrb[27].mxu0  ;;  %v1275_v31 = vpop.f32.mrb[27].mxu1  ;;  %v1322_v32 = vsel %vm1290_vm5, %v1179_v16, %v1306_v22  ;;  %v1309_v33 = vmul.f32 0.01, %v1270_v23  ;;  %v1338_v26 = vld [vmem:[%s2167_s5] sm:$0x3] }
 0x3bd   : > { %v1187_v34 = vadd.f32 %v1186_v30, %v1088_v24  ;;  %v1276_v35 = vadd.f32 %v1275_v31, %v1088_v24  ;;  %v1324_v41 = vsel %vm1292_vm6, %v1268_v19, %v1308_v25  ;;  %v1323_v57 = vsel %vm1291_vm7, %v1181_v20, %v1307_v28 }
 0x3be   : > { %vm1294_vm8 = vcmp.gt.f32.partialorder %v1185_v29, 0.0  ;;  %v1310_v36 = vmul.f32 0.01, %v1185_v29  ;;  %vm1296_vm9 = vcmp.gt.f32.partialorder %v1274_v0, 0.0  ;;  %v1312_v37 = vmul.f32 0.01, %v1274_v0 }
 0x3bf   : > { %vm1295_vm11 = vcmp.gt.f32.partialorder %v1187_v34, 0.0  ;;  %v1311_v39 = vmul.f32 0.01, %v1187_v34  ;;  %v1313_v40 = vmul.f32 0.01, %v1276_v35  ;;  %vm1297_vm12 = vcmp.gt.f32.partialorder %v1276_v35, 0.0 }
 0x3c0   : > { %v1326_v42 = vsel %vm1294_vm8, %v1185_v29, %v1310_v36  ;;  %v1328_v43 = vsel %vm1296_vm9, %v1274_v0, %v1312_v37  ;;  %v1190_v44 = vpop.f32.mrb[28].mxu0  ;;  %v1279_v45 = vpop.f32.mrb[28].mxu1  ;;  %v1325_v58 = vsel %vm1293_vm10, %v1270_v23, %v1309_v33  ;;  %v1824_v27 = vmov 1983009808  }
 0x3c1   : > { %v1698_v46 = vpack.c.bf16 %v1326_v42, %v1322_v32  ;;  %v1706_v47 = vpack.c.bf16 %v1328_v43, %v1324_v41  ;;  %v1191_v48 = vadd.f32 %v1190_v44, %v1093_v38  ;;  %v1280_v49 = vadd.f32 %v1279_v45, %v1093_v38  ;;  %v1192_v50 = vpop.f32.mrb[29].mxu0  ;;  %v1281_v51 = vpop.f32.mrb[29].mxu1 }
 0x3c2   : > { %v1193_v52 = vadd.f32 %v1192_v50, %v1093_v38  ;;  %v1282_v53 = vadd.f32 %v1281_v51, %v1093_v38  ;;  %v1327_v55 = vsel %vm1295_vm11, %v1187_v34, %v1311_v39  ;;  %v1329_v59 = vsel %vm1297_vm12, %v1276_v35, %v1313_v40 }
 0x3c3   : > { %v1196_v54 = vpop.f32.mrb[30].mxu0  ;;  %v1314_v56 = vmul.f32 0.01, %v1191_v48  ;;  %vm1298_vm13 = vcmp.gt.f32.partialorder %v1191_v48, 0.0  ;;  %vm1300_vm14 = vcmp.gt.f32.partialorder %v1280_v49, 0.0  ;;  %v1285_v1 = vpop.f32.mrb[30].mxu1  ;;  %v1696_v3 = vpack.c.bf16 %v1327_v55, %v1323_v57 }
 0x3c4   : > { %v1316_v61 = vmul.f32 0.01, %v1280_v49  ;;  %vm1299_vm15 = vcmp.gt.f32.partialorder %v1193_v52, 0.0  ;;  %v1315_v62 = vmul.f32 0.01, %v1193_v52  ;;  %vm1301_vm0 = vcmp.gt.f32.partialorder %v1282_v53, 0.0 }
 0x3c5   : > { %v1197_v63 = vadd.f32 %v1196_v54, %v1098_v60  ;;  %v1198_v2 = vpop.f32.mrb[31].mxu0  ;;  %v1317_v4 = vmul.f32 0.01, %v1282_v53  ;;  %v1286_v5 = vadd.f32 %v1285_v1, %v1098_v60  ;;  %v1287_v7 = vpop.f32.mrb[31].mxu1  ;;  %v1704_v8 = vpack.c.bf16 %v1329_v59, %v1325_v58  ;;  %1697 = vmatprep.subr.bf16.mxu0 %v1696_v3 }
 0x3c6   : > { %v1199_v6 = vadd.f32 %v1198_v2, %v1098_v60  ;;  %v1330_v9 = vsel %vm1298_vm13, %v1191_v48, %v1314_v56  ;;  %v1288_v11 = vadd.f32 %v1287_v7, %v1098_v60  ;;  %1699 = vmatpush1.bf16.msra.mxu0 %v1698_v46  ;;  %v1332_v14 = vsel %vm1300_vm14, %v1280_v49, %v1316_v61 }
 0x3c7   : > { %vm1302_vm1 = vcmp.gt.f32.partialorder %v1197_v63, 0.0  ;;  %v1318_v10 = vmul.f32 0.01, %v1197_v63  ;;  %vm1304_vm3 = vcmp.gt.f32.partialorder %v1286_v5, 0.0  ;;  %v1320_v12 = vmul.f32 0.01, %v1286_v5  ;;  %1705 = vmatprep.subr.bf16.mxu1 %v1704_v8 }
 0x3c8   : > { %vm1303_vm4 = vcmp.gt.f32.partialorder %v1199_v6, 0.0  ;;  %v1319_v13 = vmul.f32 0.01, %v1199_v6  ;;  %vm1305_vm5 = vcmp.gt.f32.partialorder %v1288_v11, 0.0  ;;  %v1321_v16 = vmul.f32 0.01, %v1288_v11  ;;  %1707 = vmatpush1.bf16.msra.mxu1 %v1706_v47 }
 0x3c9   : > { %v1334_v15 = vsel %vm1302_vm1, %v1197_v63, %v1318_v10  ;;  %v1336_v18 = vsel %vm1304_vm3, %v1286_v5, %v1320_v12  ;;  %v1331_v19 = vsel %vm1299_vm15, %v1193_v52, %v1315_v62  ;;  %v1333_v23 = vsel %vm1301_vm0, %v1282_v53, %v1317_v4 }
 0x3ca   : > { %v1702_v17 = vpack.c.bf16 %v1334_v15, %v1330_v9  ;;  %v1335_v20 = vsel %vm1303_vm4, %v1199_v6, %v1319_v13  ;;  %v1710_v21 = vpack.c.bf16 %v1336_v18, %v1332_v14  ;;  %v1337_v24 = vsel %vm1305_vm5, %v1288_v11, %v1321_v16 }
 0x3cb   : > { %v1700_v22 = vpack.c.bf16 %v1335_v20, %v1331_v19  ;;  %v1708_v25 = vpack.c.bf16 %v1337_v24, %v1333_v23  ;;  %v1491_v28 = vunpack.c.l.s4 %v1824_v27  ;;  %v1493_v29 = vlaneseq }
 0x3cd   : > { %1701 = vmatprep.subr.bf16.mxu0 %v1700_v22  ;;  %1709 = vmatprep.subr.bf16.mxu1 %v1708_v25  ;;  %v1492_v0 = vunpack.c.0.s8 %v1491_v28  ;;  %v1494_v30 = vshrl.u32 %v1493_v29, 7 }
 0x3ce   : > { %1703 = vmatpush1.bf16.msra.mxu0 %v1702_v17  ;;  %1711 = vmatpush1.bf16.msra.mxu1 %v1710_v21 }
 0x3cf   : > { %v1495_v32 = vsub.s32 %v1492_v0, %v1494_v30 }
 0x3d1   : > { %1640 = vmatmul.mubr.msk.f32.vlgmr.msra.gmra.mrb[32].mxu0 %vm563_vm2, %v1338_v26  ;;  %1641 = vmatmul.mubr.msk.f32.vlgmr.msra.gmra.mrb[32].mxu1 %vm563_vm2, %v1338_v26 }
 0x4a4   : > { %v1408_v31 = vpop.f32.mrb[32].mxu0  ;;  %v1479_v33 = vpop.f32.mrb[32].mxu1 }
 0x4a5   : > { %v1410_v34 = vpop.f32.mrb[33].mxu0  ;;  %v1481_v36 = vpop.f32.mrb[33].mxu1 }
 0x4a6   : > { %v1488_v35 = vcombine.low %v1408_v31, %v1410_v34  ;;  %v1489_v37 = vcombine.low %v1479_v33, %v1481_v36 }
 0x4a8   : > { %v1496_v38 = vrot.slane %v1488_v35, %v1495_v32  ;;  %v1503_v39 = vrot.slane %v1489_v37, %v1495_v32 }
 0x4aa   : > { %v1504_v40 = vcombine.low %v1496_v38, %v1503_v39 }
 0x4ac   : > { %1506 = vst [vmem:[%s245_s29] sm:$0xff] %v1504_v40 }
 0x4ad   : > { %1771 = shalt.err (!%p1768_p3)
}
 0x4ae   : > { %s1772_s17 = scalar_lea.hbm %s2120_s12, 128  ;;  %s1776_s20 = scalar_lea.hbm %s2168_s6, 512 }
 0x4af   : > { %p1773_p4 = scmp.ne.s32.totalorder %s2120_s12, %s1772_s17  ;;  %p1777_p9 = scmp.lt.u32.totalorder %s2120_s12, %s2168_s6 }
 0x4b0   : > { %p1778_p10 = scmp.lt.u32.totalorder %s1776_s20, %s1772_s17  ;;  %p1780_p12 = scmp.lt.u32.totalorder %s1772_s17, %s2120_s12 }
 0x4b1   : > { %p1774_p7 = pnand %p1773_p4, %p1899_p5 }
 0x4b2   : > { %p1779_p11 = por %p1778_p10, %p1777_p9 }
 0x4b3   : > { %p1775_p8 = pneg %p1774_p7 }
 0x4b4   : > { %p1781_p13 = por %p1780_p12, %p1779_p11 }
 0x4b6   : > { %p1782_p0 = pnand %p1781_p13, %p1775_p8 }
 0x4b8   : > { %1785 = shalt.err (!%p1782_p0)
}
 0x4b9   : > { %1712 = dma.vmem_to_hbm [thread:$0]  (%p1899_p5), %s2122_s9, 128, %s2120_s12, %s1508_s13  }
 0x4ba PF: > { %p1718_p1 = scmp.ge.s32.totalorder %s1820_s24, 2  ;;  %s1534_s29 = sand.u32 1, %s1808_s21  }
 0x4bb   : > { %s1535_s10 = scalar_lea.sflag [#allocation3], %s1534_s29 }
 0x4bc   : > { %p1715_p2 = pnand %p1718_p1, %p1903_p6 }
 0x4be   : > { %1803 = dma.done.wait (!%p1715_p2), %s1535_s10, 128  }
 0x4bf   : > { %1805 = vsyncadd (!%p1715_p2), %s1535_s10, 4294967168  ;;  %p16_p3 = scmp.ge.s32.totalorder %s1886_s27, 6   ;;  %s2171_s21 = smov %s1812_s22 }
 0x4c0   : > { %s2172_s22 = smov %s1816_s23  ;;  %s2173_s23 = smov %s1897_s30 }
 0x4c1   : > { %s2174_s24 = smov %s1886_s27  ;;  %18 = sbr.rel (!%p16_p3) target bundleno = 3 (0x3), region = 83 }
 0x4c8   :  { %1540 = vsyncpa [#allocation3], 1 }
 0x4c9   :  { %1542 = vsyncpa [#allocation3 + $0x1], 1 }

</bundles_post_ra>
